<compile_context>
chip_gen: v5e
topology: v5e:2x2
jax: 0.10.0
libtpu: 0.0.40
codegen_flags: <defaults>
</compile_context>

<pallas_src>
import functools
import math

import jax
import jax.numpy as jnp
from jax.experimental import pallas as pl
from jax.experimental.pallas import tpu as pltpu


def make_positional_encoding(d_model, max_len=5000, dtype=jnp.float32):
    """Same pe buffer as the PyTorch module: shape (max_len, 1, d_model)."""
    position = jnp.arange(0, max_len, dtype=jnp.float32)[:, None]                 # (max_len, 1)
    div_term = jnp.exp(
        jnp.arange(0, d_model, 2, dtype=jnp.float32) * (-(math.log(10000.0) / d_model))
    )                                                                             # (d_model//2,)
    pe = jnp.zeros((max_len, d_model), dtype=jnp.float32)
    pe = pe.at[:, 0::2].set(jnp.sin(position * div_term))
    pe = pe.at[:, 1::2].set(jnp.cos(position * div_term))
    return pe[:, None, :].astype(dtype)                                           # (max_len, 1, d_model)


# ---------------------------------------------------------------------------
# Kernels
# ---------------------------------------------------------------------------

def _pe_add_kernel_3d(x_ref, pe_ref, o_ref):
    # x_ref/o_ref: (tS, B, D); pe_ref: (tS, 1, D).  Pure VPU add; pe broadcasts over the
    # batch dim in-register (its tile is DMA'd once per seq block, not once per batch).
    o_ref[...] = (x_ref[...] + pe_ref[...]).astype(o_ref.dtype)


def _pe_add_kernel_lane_dense(x_ref, pe_ref, o_ref, *, batch):
    # x_ref/o_ref: (tS, B*D); pe_ref: (tS, D).  Broadcast pe along the lane axis inside
    # VMEM (concatenate B copies), so the output store is lane-dense (unmasked vst) even
    # when D itself is not a multiple of 128.
    pe_tile = jnp.concatenate([pe_ref[...]] * batch, axis=-1)
    o_ref[...] = (x_ref[...] + pe_tile).astype(o_ref.dtype)


# ---------------------------------------------------------------------------
# Tiling
# ---------------------------------------------------------------------------

# Pipeline-buffer budget.  Chosen so the double-buffered footprint stays well inside the
# tightest default scoped VMEM (v5e: 16 MiB) and leaves headroom on v7x (64 MiB physical).
_VMEM_BUDGET_BYTES = 20 * 1024 * 1024


def _choose_seq_tile(S, B, D, itemsize, vmem_budget_bytes=_VMEM_BUDGET_BYTES):
    """Largest seq tile whose double-buffered pipeline footprint fits the budget.

    Per seq row the pipeline holds 2x(x) + 2x(out) = 4 rows of B*D elements plus 2 pe
    rows of D (default Buffered(2); deeper buffering buys nothing for a DMA-limited
    elementwise add and only shrinks the blocks).
    """
    per_row = (4 * B + 2) * D * itemsize
    tS = max(8, vmem_budget_bytes // per_row)
    if S >= 16:
        # Keep >= 2 seq steps so v7x's two TensorCores both get work: a 1-D "parallel"
        # grid only megacore-shards if there are at least 2 grid steps.
        half = max(8, ((S + 1) // 2) // 8 * 8)
        tS = min(tS, half)
    tS = min(tS, S)
    if tS < S:
        tS = max(8, (tS // 8) * 8)
    return int(tS)


# ---------------------------------------------------------------------------
# Forward
# ---------------------------------------------------------------------------

def positional_encoding_forward(x, pe):
    """x: (S, B, D); pe: (max_len, 1, D) with max_len >= S.  Returns x + pe[:S]."""
    S, B, D = x.shape
    assert pe.shape[0] >= S and pe.shape[-1] == D

    if pe.dtype != x.dtype:
        # Match the activation dtype once here: halves pe read traffic for bf16/fp16
        # activations and avoids a mixed-dtype add/store inside the kernel.
        pe = pe.astype(x.dtype)

    itemsize = jnp.dtype(x.dtype).itemsize
    tS = _choose_seq_tile(S, B, D, itemsize)
    n_seq = pl.cdiv(S, tS)

    # Explicit VMEM limit derived from the actual double-buffered footprint (+ headroom),
    # valid on all generations (v5e default scoped is only 16 MiB; v7x physical is 64 MiB).
    footprint = tS * (4 * B + 2) * D * itemsize
    vmem_limit = int(min(max(footprint + (8 << 20), 16 << 20), 48 << 20))
    cparams = pltpu.CompilerParams(
        dimension_semantics=("parallel",),
        vmem_limit_bytes=vmem_limit,
    )
    # TODO(synk): for extreme B*D (a single seq row of the pipeline > ~20 MiB) the batch
    # axis would need tiling as well; typical transformer shapes never hit this.
    # NOTE: input_output_aliases={0: 0} could drop the extra HBM output allocation if the
    # caller donates x; left off since donation is a caller-side contract.

    lane_dense = (D % 128 != 0) and ((B * D) % 128 == 0)
    if lane_dense:
        # D alone would produce masked partial stores; (S, B*D) is lane-dense and the
        # reshapes below are free (contiguous views).
        x2 = x.reshape(S, B * D)
        pe2 = pe.reshape(pe.shape[0], D)
        out = pl.pallas_call(
            functools.partial(_pe_add_kernel_lane_dense, batch=B),
            out_shape=jax.ShapeDtypeStruct((S, B * D), x.dtype),
            grid_spec=pl.GridSpec(
                grid=(n_seq,),
                in_specs=[
                    pl.BlockSpec((tS, B * D), lambda s: (s, 0)),
                    pl.BlockSpec((tS, D), lambda s: (s, 0)),
                ],
                out_specs=pl.BlockSpec((tS, B * D), lambda s: (s, 0)),
            ),
            compiler_params=cparams,
        )(x2, pe2)
        return out.reshape(S, B, D)

    # Primary path: one contiguous (tS, B, D) slab of x/out per grid step, small
    # (tS, 1, D) pe tile broadcast over B inside the kernel.  (For D % 128 != 0 and
    # B*D % 128 != 0 — e.g. tiny demo shapes — stores are lane-masked; production
    # d_model of 512/768/1024 is already lane-dense.)
    return pl.pallas_call(
        _pe_add_kernel_3d,
        out_shape=jax.ShapeDtypeStruct((S, B, D), x.dtype),
        grid_spec=pl.GridSpec(
            grid=(n_seq,),
            in_specs=[
                pl.BlockSpec((tS, B, D), lambda s: (s, 0, 0)),
                pl.BlockSpec((tS, 1, D), lambda s: (s, 0, 0)),
            ],
            out_specs=pl.BlockSpec((tS, B, D), lambda s: (s, 0, 0)),
        ),
        compiler_params=cparams,
    )(x, pe)


if __name__ == "__main__":
    d_model = 32
    max_len = 64          # small max_len for the demo (module default is 5000)

    key = jax.random.PRNGKey(0)
    k1, k2 = jax.random.split(key)
    pe = make_positional_encoding(d_model, max_len=max_len)

    # Case 1: primary folded-batch 3-D block path (B*D not a multiple of 128).
    seq_len, batch = 8, 2
    x = jax.random.normal(k1, (seq_len, batch, d_model), dtype=jnp.float32)
    out = jax.block_until_ready(positional_encoding_forward(x, pe))
    ref = x + pe[:seq_len]
    assert out.shape == (seq_len, batch, d_model)
    assert jnp.allclose(out, ref, atol=1e-6), "mismatch vs reference (3-D path)"

    # Case 2: lane-dense path (D % 128 != 0 but B*D % 128 == 0).
    seq_len2, batch2 = 8, 4
    x2 = jax.random.normal(k2, (seq_len2, batch2, d_model), dtype=jnp.float32)
    out2 = jax.block_until_ready(positional_encoding_forward(x2, pe))
    ref2 = x2 + pe[:seq_len2]
    assert out2.shape == (seq_len2, batch2, d_model)
    assert jnp.allclose(out2, ref2, atol=1e-6), "mismatch vs reference (lane-dense path)"

    print("KERNEL_OK")
</pallas_src>

<mosaic_0001>
module attributes {stable_mosaic.version = 11 : i64} {
  func.func @_pe_add_kernel_3d(%arg0: i32, %arg1: memref<8x2x32xf32, #tpu.memory_space<vmem>>, %arg2: memref<8x1x32xf32, #tpu.memory_space<vmem>>, %arg3: memref<8x2x32xf32, #tpu.memory_space<vmem>>) attributes {dimension_semantics = [#tpu.dimension_semantics<parallel>], iteration_bounds = array<i64: 1>, scalar_prefetch = 0 : i64, scratch_operands = 0 : i64, tpu.core_type = #tpu.core_type<tc>, window_params = [{transform_indices = @transform_0, window_bounds = array<i64: 8, 2, 32>}, {transform_indices = @transform_1, window_bounds = array<i64: 8, 1, 32>}, {transform_indices = @transform_2, window_bounds = array<i64: 8, 2, 32>}]} {
    %c0 = arith.constant 0 : index
    %c0_0 = arith.constant 0 : index
    %c0_1 = arith.constant 0 : index
    %0 = vector.load %arg1[%c0, %c0_0, %c0_1] : memref<8x2x32xf32, #tpu.memory_space<vmem>>, vector<8x2x32xf32>
    %c0_2 = arith.constant 0 : index
    %c0_3 = arith.constant 0 : index
    %c0_4 = arith.constant 0 : index
    %1 = vector.load %arg2[%c0_2, %c0_3, %c0_4] : memref<8x1x32xf32, #tpu.memory_space<vmem>>, vector<8x1x32xf32>
    %2 = vector.broadcast %1 : vector<8x1x32xf32> to vector<8x2x32xf32>
    %3 = arith.addf %0, %2 : vector<8x2x32xf32>
    %c0_5 = arith.constant 0 : index
    %c0_6 = arith.constant 0 : index
    %c0_7 = arith.constant 0 : index
    %4 = vector.load %arg3[%c0_5, %c0_6, %c0_7] : memref<8x2x32xf32, #tpu.memory_space<vmem>>, vector<8x2x32xf32>
    tpu.vector_store %arg3[%c0_5, %c0_6, %c0_7], %3 {strides = array<i32>} : memref<8x2x32xf32, #tpu.memory_space<vmem>>, vector<8x2x32xf32>,
    return
  }
  func.func @transform_0(%arg0: i32) -> (i32, i32, i32) {
    %c0_i32 = arith.constant 0 : i32
    %c0_i32_0 = arith.constant 0 : i32
    %c0_i32_1 = arith.constant 0 : i32
    return %arg0, %c0_i32, %c0_i32_0 : i32, i32, i32
  }
  func.func @transform_1(%arg0: i32) -> (i32, i32, i32) {
    %c0_i32 = arith.constant 0 : i32
    %c0_i32_0 = arith.constant 0 : i32
    %c0_i32_1 = arith.constant 0 : i32
    return %arg0, %c0_i32, %c0_i32_0 : i32, i32, i32
  }
  func.func @transform_2(%arg0: i32) -> (i32, i32, i32) {
    %c0_i32 = arith.constant 0 : i32
    %c0_i32_0 = arith.constant 0 : i32
    %c0_i32_1 = arith.constant 0 : i32
    return %arg0, %c0_i32, %c0_i32_0 : i32, i32, i32
  }
}

</mosaic_0001>

<bundles_post_ra>
// kernel: tpu_custom_call.1
= control target key start
LH: loop header
LB: loop body
LE: loop exit
PB: predicated region body
PF: predicated region fallthrough
CT: control target
= control target key end

     0   :  { %vm60_vm0 = vcmask 254976   ;;  %s201_s0 = inlined_call_operand.vmem [shape: f32[8,2,32], index: 0, kind: input, shape index: {}]   ;;  %s202_s1 = inlined_call_operand.vmem [shape: f32[64,1,32], index: 1, kind: input, shape index: {}]   ;;  %s203_s2 = inlined_call_operand.hbm [shape: f32[8,2,32], index: 2, kind: output, shape index: {}]  }
   0x1   :  { %v12_v0 = vld [vmem:[%s201_s0] sm:$0x3]  ;;  %v13_v2 = vld [vmem:[%s201_s0 + $0x2] sm:$0x3]  ;;  %v14_v5 = vld [vmem:[%s201_s0 + $0x4] sm:$0x3] }
   0x2   :  { %v90_v1 = vld [vmem:[%s202_s1] ss:$0 sm:$0xff]  ;;  %v91_v4 = vld [vmem:[%s202_s1 + $0x1] ss:$0 sm:$0xff]  ;;  %v92_v6 = vld [vmem:[%s202_s1 + $0x2] ss:$0 sm:$0xff] }
   0x3   :  { %v52_v3 = vadd.f32 %v90_v1, %v12_v0  ;;  %v15_v7 = vld [vmem:[%s201_s0 + $0x6] sm:$0x3]  ;;  %v53_v8 = vadd.f32 %v91_v4, %v13_v2  ;;  %v93_v9 = vld [vmem:[%s202_s1 + $0x3] ss:$0 sm:$0xff]  ;;  %v16_v10 = vld [vmem:[%s201_s0 + $0x8] sm:$0x3]  ;;  %v54_v11 = vadd.f32 %v92_v6, %v14_v5 }
   0x4   :  { %v94_v12 = vld [vmem:[%s202_s1 + $0x4] ss:$0 sm:$0xff]  ;;  %v17_v13 = vld [vmem:[%s201_s0 + $0xa] sm:$0x3]  ;;  %v55_v14 = vadd.f32 %v93_v9, %v15_v7  ;;  %v95_v15 = vld [vmem:[%s202_s1 + $0x5] ss:$0 sm:$0xff] }
   0x5   :  { %61 = vst.msk [vmem:[#allocation2] sm:$0x3] %vm60_vm0, %v52_v3  ;;  %v56_v16 = vadd.f32 %v94_v12, %v16_v10  ;;  %v18_v17 = vld [vmem:[%s201_s0 + $0xc] sm:$0x3]  ;;  %v57_v18 = vadd.f32 %v95_v15, %v17_v13  ;;  %v96_v19 = vld [vmem:[%s202_s1 + $0x6] ss:$0 sm:$0xff] }
   0x6   :  { %62 = vst.msk [vmem:[#allocation2 + $0x2] sm:$0x3] %vm60_vm0, %v53_v8  ;;  %v19_v20 = vld [vmem:[%s201_s0 + $0xe] sm:$0x3]  ;;  %v97_v21 = vld [vmem:[%s202_s1 + $0x7] ss:$0 sm:$0xff]  ;;  %v58_v22 = vadd.f32 %v96_v19, %v18_v17 }
   0x7   :  { %63 = vst.msk [vmem:[#allocation2 + $0x4] sm:$0x3] %vm60_vm0, %v54_v11 }
   0x8   :  { %64 = vst.msk [vmem:[#allocation2 + $0x6] sm:$0x3] %vm60_vm0, %v55_v14 }
   0x9   :  { %65 = vst.msk [vmem:[#allocation2 + $0x8] sm:$0x3] %vm60_vm0, %v56_v16 }
   0xa   :  { %66 = vst.msk [vmem:[#allocation2 + $0xa] sm:$0x3] %vm60_vm0, %v57_v18 }
   0xb   :  { %7 = vsyncpa [#allocation3], 0  ;;  %s124_s13 = smov [#allocation2]   ;;  %s75_s17 = sshll.u32 %s203_s2, 4  ;;  %v59_v23 = vadd.f32 %v97_v21, %v19_v20  ;;  %67 = vst.msk [vmem:[#allocation2 + $0xc] sm:$0x3] %vm60_vm0, %v58_v22  ;;  %s76_s17 = int_to_ptr.hbm [resolvable:$true] %s75_s17 }
   0xc   :  { %s73_s14 = sshll.u32 %s124_s13, 4  ;;  %s125_s0 = smov 32   ;;  %s74_s14 = int_to_ptr.vmem [resolvable:$true] %s73_s14 }
   0xd   :  { %68 = vst.msk [vmem:[#allocation2 + $0xe] sm:$0x3] %vm60_vm0, %v59_v23  ;;  %s126_s18 = smov 2  }
   0xe   :  { %81 = dma.vmem_to_hbm [thread:$0]  %s74_s14, 256, %s76_s17, [#allocation3], %s125_s0, %s125_s0, %s126_s18  }
   0xf   :  { %122 = dma.done.wait [#allocation3], 256  }
  0x10   :  { %123 = vsyncadd [#allocation3], 4294967040 }
  0x11   :  { %86 = vsyncpa [#allocation3], 1 }

</bundles_post_ra>
